<compile_context>
chip_gen: v7x
topology: tpu7x:2x2x1
jax: 0.10.0
libtpu: 0.0.40
codegen_flags: <defaults>
</compile_context>

<pallas_src>
import math

import jax
import jax.numpy as jnp
from jax.experimental import pallas as pl
from jax.experimental.pallas import tpu as pltpu


def _round_up(x, m):
    return (x + m - 1) // m * m


def _linear_bias_kernel(x_ref, w_ref, b_ref, o_ref):
    # x_ref: (TM, K) input dtype, w_ref: (K, TN) bf16, b_ref: (1, TN) f32,
    # o_ref: (TM, TN) f32.
    x = x_ref[...].astype(jnp.bfloat16)          # VPU cast in VMEM, no HBM cost
    acc = jnp.dot(x, w_ref[...], preferred_element_type=jnp.float32)
    o_ref[...] = (acc + b_ref[...]).astype(o_ref.dtype)


def linear_pallas(x, w, b, *, tm=512, weight_vmem_budget=16 * 1024 * 1024):
    """y = x @ w + b.  x: (..., K); w: (K, N) bf16; b: (N,) f32."""
    orig_shape = x.shape
    K = orig_shape[-1]
    N = w.shape[1]

    x2 = x.reshape(-1, K)
    M = x2.shape[0]

    # --- M tile: large (roofline), multiple of 8 sublanes, but never so large
    #     that the whole problem collapses into a single grid step (keep >= 2
    #     steps so both v7x TensorCores get work).  No padding of M.
    tm_eff = min(tm, max(8, _round_up(pl.cdiv(M, 2), 8)))
    n_m = pl.cdiv(M, tm_eff)

    # --- N tile: whole out_dim if the (K, N) weight slab fits the budget,
    #     otherwise a 128-lane multiple (lane-dense, unmasked output stores).
    w_bytes = jnp.dtype(w.dtype).itemsize
    x_bytes = jnp.dtype(x.dtype).itemsize
    if K * N * w_bytes <= weight_vmem_budget:
        tn_eff = N
    else:
        tn_eff = min(N, max(128, (weight_vmem_budget // (K * w_bytes)) // 128 * 128))
    n_n = pl.cdiv(N, tn_eff)

    b2 = b.reshape(1, N).astype(jnp.float32)
    grid = (n_n, n_m)   # N outer / M inner: weight block constant over inner axis

    cost = pl.CostEstimate(
        flops=2 * M * K * N,
        transcendentals=0,
        bytes_accessed=x_bytes * M * K + w_bytes * K * N + 4 * N + 4 * M * N,
    )

    def attempt(single_buffer):
        res_kw = {"pipeline_mode": pl.Buffered(1)} if single_buffer else {}
        n_buf = 1 if single_buffer else 2
        # Resident VMEM estimate: x/out double-buffered, weight/bias n_buf.
        resident = (2 * tm_eff * K * x_bytes
                    + n_buf * K * tn_eff * w_bytes
                    + n_buf * 8 * tn_eff * 4
                    + 2 * tm_eff * tn_eff * 4)
        vmem_limit = int(min(64 << 20, max(32 << 20, 2 * resident + (8 << 20))))
        return pl.pallas_call(
            _linear_bias_kernel,
            out_shape=jax.ShapeDtypeStruct((M, N), jnp.float32),
            grid_spec=pltpu.PrefetchScalarGridSpec(
                num_scalar_prefetch=0,
                grid=grid,
                in_specs=[
                    pl.BlockSpec((tm_eff, K), lambda j, i: (i, 0)),
                    pl.BlockSpec((K, tn_eff), lambda j, i: (0, j), **res_kw),
                    pl.BlockSpec((1, tn_eff), lambda j, i: (0, j), **res_kw),
                ],
                out_specs=pl.BlockSpec((tm_eff, tn_eff), lambda j, i: (i, j)),
            ),
            compiler_params=pltpu.CompilerParams(
                dimension_semantics=("parallel", "parallel"),
                vmem_limit_bytes=vmem_limit),
            cost_estimate=cost,
        )(x2, w, b2)

    try:
        out = attempt(single_buffer=True)
    except Exception:
        # pipeline_mode=pl.Buffered(1) unsupported in this build: fall back to
        # default double-buffering (identical results, just more VMEM).
        out = attempt(single_buffer=False)

    return out.reshape(orig_shape[:-1] + (N,))


class PlainProjectionPallas:
    """Matches torch PlainProjection(in_dim, out_dim): a single Linear layer."""

    def __init__(self, in_dim, out_dim, key=None):
        self.in_dim = in_dim
        self.out_dim = out_dim
        if key is None:
            key = jax.random.PRNGKey(0)
        kw, kb = jax.random.split(key)
        # Stored as (in_dim, out_dim) = torch weight.T — same math as x @ W.T.
        # TODO(synk): exact torch `weight_init` values not reproduced; forward
        # semantics (Linear) are.
        bound = 1.0 / math.sqrt(in_dim)
        w = jax.random.uniform(kw, (in_dim, out_dim), minval=-bound,
                               maxval=bound, dtype=jnp.float32)
        b = jax.random.uniform(kb, (out_dim,), minval=-bound, maxval=bound,
                               dtype=jnp.float32)
        # Pad out_dim to a 128-lane multiple ONCE at init (lane-dense stores).
        self._padded_out = _round_up(out_dim, 128)
        if self._padded_out != out_dim:
            w = jnp.pad(w, ((0, 0), (0, self._padded_out - out_dim)))
            b = jnp.pad(b, (0, self._padded_out - out_dim))
        self.w = w.astype(jnp.bfloat16)   # bf16 weights: full MXU rate, half HBM
        self.b = b                        # bias kept f32 (added post-accumulate)

    def __call__(self, x):
        y = linear_pallas(x, self.w, self.b)
        if self._padded_out != self.out_dim:
            y = y[..., :self.out_dim]
        return y


def _reference_forward(model, x):
    """Pure-JAX reference using the same bf16-in / f32-accumulate contract."""
    y = jnp.dot(x.astype(jnp.bfloat16), model.w,
                preferred_element_type=jnp.float32) + model.b.astype(jnp.float32)
    return y[..., :model.out_dim]


if __name__ == "__main__":
    key = jax.random.PRNGKey(0)
    k_inp, k_par = jax.random.split(key)

    batch, seq, in_dim, out_dim = 2, 8, 64, 128
    x = jax.random.normal(k_inp, (batch, seq, in_dim), dtype=jnp.float32)

    model = PlainProjectionPallas(in_dim, out_dim, key=k_par)

    out = jax.block_until_ready(model(x))
    assert out.shape == (batch, seq, out_dim), out.shape
    assert out.dtype == jnp.float32, out.dtype

    ref = jax.block_until_ready(_reference_forward(model, x))
    assert jnp.allclose(out, ref, atol=1e-4, rtol=1e-4), \
        float(jnp.max(jnp.abs(out - ref)))

    print("KERNEL_OK")
</pallas_src>

<mosaic_0001>
module attributes {stable_mosaic.version = 11 : i64} {
  func.func @_linear_bias_kernel(%arg0: i32, %arg1: i32, %arg2: memref<8x64xf32, #tpu.memory_space<vmem>>, %arg3: memref<64x128xbf16, #tpu.memory_space<vmem>>, %arg4: memref<1x128xf32, #tpu.memory_space<vmem>>, %arg5: memref<8x128xf32, #tpu.memory_space<vmem>>) attributes {dimension_semantics = [#tpu.dimension_semantics<parallel>, #tpu.dimension_semantics<parallel>], iteration_bounds = array<i64: 1, 2>, scalar_prefetch = 0 : i64, scratch_operands = 0 : i64, tpu.core_type = #tpu.core_type<tc>, window_params = [{transform_indices = @transform_0, window_bounds = array<i64: 8, 64>}, {pipeline_mode = #tpu.pipeline_mode<synchronous>, transform_indices = @transform_1, window_bounds = array<i64: 64, 128>}, {pipeline_mode = #tpu.pipeline_mode<synchronous>, transform_indices = @transform_2, window_bounds = array<i64: 1, 128>}, {transform_indices = @transform_3, window_bounds = array<i64: 8, 128>}]} {
    %c0 = arith.constant 0 : index
    %c0_0 = arith.constant 0 : index
    %0 = vector.load %arg2[%c0, %c0_0] : memref<8x64xf32, #tpu.memory_space<vmem>>, vector<8x64xf32>
    %1 = arith.truncf %0 : vector<8x64xf32> to vector<8x64xbf16>
    %c0_1 = arith.constant 0 : index
    %c0_2 = arith.constant 0 : index
    %2 = vector.load %arg3[%c0_1, %c0_2] : memref<64x128xbf16, #tpu.memory_space<vmem>>, vector<64x128xbf16>
    %cst = arith.constant dense<0.000000e+00> : vector<8x128xf32>
    %3 = tpu.matmul %1, %2, %cst {dimension_numbers = #tpu.dot_dimension_numbers<[1], [0], [0], [1], [0, 0, 1, 1], [], []>} : vector<8x64xbf16>, vector<64x128xbf16>, vector<8x128xf32> -> vector<8x128xf32>
    %c0_3 = arith.constant 0 : index
    %c0_4 = arith.constant 0 : index
    %4 = vector.load %arg4[%c0_3, %c0_4] : memref<1x128xf32, #tpu.memory_space<vmem>>, vector<1x128xf32>
    %5 = vector.broadcast %4 : vector<1x128xf32> to vector<8x128xf32>
    %6 = arith.addf %3, %5 : vector<8x128xf32>
    %c0_5 = arith.constant 0 : index
    %c0_6 = arith.constant 0 : index
    %7 = vector.load %arg5[%c0_5, %c0_6] : memref<8x128xf32, #tpu.memory_space<vmem>>, vector<8x128xf32>
    tpu.vector_store %arg5[%c0_5, %c0_6], %6 {strides = array<i32>} : memref<8x128xf32, #tpu.memory_space<vmem>>, vector<8x128xf32>,
    return
  }
  func.func @transform_0(%arg0: i32, %arg1: i32) -> (i32, i32) {
    %c0_i32 = arith.constant 0 : i32
    %c0_i32_0 = arith.constant 0 : i32
    return %arg1, %c0_i32 : i32, i32
  }
  func.func @transform_1(%arg0: i32, %arg1: i32) -> (i32, i32) {
    %c0_i32 = arith.constant 0 : i32
    %c0_i32_0 = arith.constant 0 : i32
    return %c0_i32, %arg0 : i32, i32
  }
  func.func @transform_2(%arg0: i32, %arg1: i32) -> (i32, i32) {
    %c0_i32 = arith.constant 0 : i32
    %c0_i32_0 = arith.constant 0 : i32
    return %c0_i32, %arg0 : i32, i32
  }
  func.func @transform_3(%arg0: i32, %arg1: i32) -> (i32, i32) {
    %c0_i32 = arith.constant 0 : i32
    return %arg1, %arg0 : i32, i32
  }
}

module attributes {stable_mosaic.version = 11 : i64} {
  func.func @_linear_bias_kernel(%arg0: i32, %arg1: i32, %arg2: memref<8x64xf32, #tpu.memory_space<vmem>>, %arg3: memref<64x128xbf16, #tpu.memory_space<vmem>>, %arg4: memref<1x128xf32, #tpu.memory_space<vmem>>, %arg5: memref<8x128xf32, #tpu.memory_space<vmem>>) attributes {dimension_semantics = [#tpu.dimension_semantics<parallel>, #tpu.dimension_semantics<parallel>], iteration_bounds = array<i64: 1, 2>, scalar_prefetch = 0 : i64, scratch_operands = 0 : i64, tpu.core_type = #tpu.core_type<tc>, window_params = [{transform_indices = @transform_0, window_bounds = array<i64: 8, 64>}, {transform_indices = @transform_1, window_bounds = array<i64: 64, 128>}, {transform_indices = @transform_2, window_bounds = array<i64: 1, 128>}, {transform_indices = @transform_3, window_bounds = array<i64: 8, 128>}]} {
    %c0 = arith.constant 0 : index
    %c0_0 = arith.constant 0 : index
    %0 = vector.load %arg2[%c0, %c0_0] : memref<8x64xf32, #tpu.memory_space<vmem>>, vector<8x64xf32>
    %1 = arith.truncf %0 : vector<8x64xf32> to vector<8x64xbf16>
    %c0_1 = arith.constant 0 : index
    %c0_2 = arith.constant 0 : index
    %2 = vector.load %arg3[%c0_1, %c0_2] : memref<64x128xbf16, #tpu.memory_space<vmem>>, vector<64x128xbf16>
    %cst = arith.constant dense<0.000000e+00> : vector<8x128xf32>
    %3 = tpu.matmul %1, %2, %cst {dimension_numbers = #tpu.dot_dimension_numbers<[1], [0], [0], [1], [0, 0, 1, 1], [], []>} : vector<8x64xbf16>, vector<64x128xbf16>, vector<8x128xf32> -> vector<8x128xf32>
    %c0_3 = arith.constant 0 : index
    %c0_4 = arith.constant 0 : index
    %4 = vector.load %arg4[%c0_3, %c0_4] : memref<1x128xf32, #tpu.memory_space<vmem>>, vector<1x128xf32>
    %5 = vector.broadcast %4 : vector<1x128xf32> to vector<8x128xf32>
    %6 = arith.addf %3, %5 : vector<8x128xf32>
    %c0_5 = arith.constant 0 : index
    %c0_6 = arith.constant 0 : index
    %7 = vector.load %arg5[%c0_5, %c0_6] : memref<8x128xf32, #tpu.memory_space<vmem>>, vector<8x128xf32>
    tpu.vector_store %arg5[%c0_5, %c0_6], %6 {strides = array<i32>} : memref<8x128xf32, #tpu.memory_space<vmem>>, vector<8x128xf32>,
    return
  }
  func.func @transform_0(%arg0: i32, %arg1: i32) -> (i32, i32) {
    %c0_i32 = arith.constant 0 : i32
    %c0_i32_0 = arith.constant 0 : i32
    return %arg1, %c0_i32 : i32, i32
  }
  func.func @transform_1(%arg0: i32, %arg1: i32) -> (i32, i32) {
    %c0_i32 = arith.constant 0 : i32
    %c0_i32_0 = arith.constant 0 : i32
    return %c0_i32, %arg0 : i32, i32
  }
  func.func @transform_2(%arg0: i32, %arg1: i32) -> (i32, i32) {
    %c0_i32 = arith.constant 0 : i32
    %c0_i32_0 = arith.constant 0 : i32
    return %c0_i32, %arg0 : i32, i32
  }
  func.func @transform_3(%arg0: i32, %arg1: i32) -> (i32, i32) {
    %c0_i32 = arith.constant 0 : i32
    return %arg1, %arg0 : i32, i32
  }
}

</mosaic_0001>

<bundles_post_ra>
// kernel: tpu_custom_call.1
= control target key start
LH: loop header
LB: loop body
LE: loop exit
PB: predicated region body
PF: predicated region fallthrough
CT: control target
= control target key end

     0   :  { %8 = vsyncpa [#allocation3], 0  ;;  %s951_s0 = inlined_call_operand.hbm [shape: f32[16,64], index: 0, kind: input, shape index: {}]   ;;  %s952_s1 = inlined_call_operand.hbm [shape: bf16[64,128], index: 1, kind: input, shape index: {}]   ;;  %s953_s2 = inlined_call_operand.vmem [shape: f32[1,128], index: 2, kind: input, shape index: {}]   ;;  %s954_s3 = inlined_call_operand.hbm [shape: f32[16,128], index: 3, kind: output, shape index: {}]  }
   0x1   :  { %10 = vsyncpa [#allocation3 + $0x1], 0 }
   0x2   :  { %11 = vsyncpa [#allocation6], 0 }
   0x3   :  { %12 = vsyncpa [#allocation4], 0 }
   0x4   :  { %14 = vsyncpa [#allocation4 + $0x1], 0  ;;  %s734_s12 = smov 0   ;;  %s736_s13 = smov 0  }
   0x5   :  { %s738_s14 = smov 0   ;;  %s740_s15 = smov 0  }
   0x6   :  { %s742_s16 = smov 0   ;;  %s744_s17 = smov 0  }
   0x7 LB: > { %s441_s18 = sadd.s32 4294967295, %s705_s17   ;;  %s442_s19 = sadd.s32 4294967294, %s705_s17   ;;  %s705_s17 = sphi %s744_s17, %s20_s17   ;;  %s701_s16 = sphi %s742_s16, %s978_s16   ;;  %s697_s15 = sphi %s740_s15, %s977_s15   ;;  %s693_s14 = sphi %s738_s14, %s976_s14   ;;  %s689_s13 = sphi %s736_s13, %s975_s13   ;;  %s685_s12 = sphi %s734_s12, %s974_s12  }
   0x8   : > { %p52_p0 = scmp.ne.s32.totalorder %s689_s13, %s685_s12  ;;  %p768_p1 = scmp.eq.s32.totalorder %s441_s18, 0 }
   0x9   : > { %p772_p2 = scmp.eq.s32.totalorder %s441_s18, 1  ;;  %p136_p3 = scmp.eq.s32.totalorder %s442_s19, 1 }
   0xa   : > { %s959_s20 = scalar_select %p768_p1, 1, 0 }
   0xb   : > { %s960_s21 = scalar_select %p772_p2, 1, 0 }
   0xc   : > { %p778_p4 = por %p768_p1, %p52_p0  ;;  %p443_p5 = scmp.ge.s32.totalorder %s705_s17, 1 }
   0xd   : > { %p783_p6 = por %p136_p3, %p52_p0  ;;  %p143_p7 = scmp.lt.s32.totalorder %s705_s17, 3 }
   0xe   : > { %s961_s22 = scalar_select %p778_p4, 1, 0 }
   0xf   : > { %s962_s23 = scalar_select %p783_p6, 1, 0 }
  0x10   : > { %p788_p8 = pnand %p443_p5, %p143_p7  ;;  %s707_s25 = smov [#allocation5]  }
  0x11   : > { %s157_s26 = sshll.u32 %s707_s25, 4  ;;  %s29_s28 = sadd.s32 1, %s701_s16  ;;  %s158_s26 = int_to_ptr.vmem [resolvable:$true] %s157_s26 }
  0x12   : > { %s963_s24 = scalar_select %p788_p8, 1, 0 }
  0x13   : > { %p488_p9 = pneg %p788_p8  ;;  %s561_s4 = scalar_lea.hbm %s952_s1, 512 }
  0x14   : > { %p562_p12 = scmp.ne.s32.totalorder %s952_s1, %s561_s4  ;;  %p568_p5 = scmp.lt.u32.totalorder %s561_s4, %s952_s1 }
  0x15   : > { %p797_p11 = pnand %p488_p9, %p768_p1 }
  0x17   : > { %p563_p13 = pneg %p797_p11 }
  0x19   : > { %p564_p0 = pnand %p563_p13, %p562_p12 }
  0x1b   : > { %p565_p3 = pneg %p564_p0 }
  0x1d   : > { %p570_p7 = pnand %p568_p5, %p565_p3 }
  0x1f   : > { %573 = shalt.err (!%p570_p7)
}
  0x20   : > { %s574_s9 = scalar_lea.vmem %s158_s26, 512  ;;  %p582_p1 = scmp.lt.s32.totalorder %s158_s26, %s158_s26 }
  0x21   : > { %p575_p9 = scmp.ne.s32.totalorder %s158_s26, %s574_s9  ;;  %p583_p4 = scmp.lt.s32.totalorder %s574_s9, %s574_s9 }
  0x23   : > { %p577_p10 = pnand %p575_p9, %p563_p13  ;;  %p584_p8 = por %p583_p4, %p582_p1 }
  0x25   : > { %p578_p6 = pneg %p577_p10 }
  0x27   : > { %p585_p2 = pnand %p584_p8, %p578_p6 }
  0x29   : > { %588 = shalt.err (!%p585_p2)
}
  0x2a   : > { %s708_s10 = smov 64   ;;  %s709_s11 = smov 4  }
  0x2b   : > { %491 = dma.hbm_to_vmem [thread:$0]  (!%p797_p11), %s952_s1, 512, %s158_s26, [#allocation6], %s708_s10, %s708_s10, %s709_s11  }
  0x2c   : > { %p30_p1 = scmp.ge.s32.totalorder %s29_s28, 2  ;;  %s39_s25 = sadd.s32 1, %s693_s14 }
  0x2d   : > { %p46_p2 = scmp.ne.s32.totalorder %s693_s14, %s689_s13  ;;  %p47_p4 = scmp.eq.s32.totalorder %s705_s17, 0 }
  0x2e   : > { %s980_s28 = smov (%p30_p1, %s29_s28), 0  ;;  %p966_p8 = scmp.ne.s32.totalorder %s960_s21, 0 }
  0x2f   : > { %p824_p6 = por %p47_p4, %p46_p2  ;;  %s36_s27 = ssub.s32 %s701_s16, %s980_s28 }
  0x30   : > { %p830_p10 = por %p966_p8, %p46_p2  ;;  %p501_p12 = scmp.lt.s32.totalorder %s705_s17, 2 }
  0x31   : > { %p37_p11 = scmp.eq.s32.totalorder %s36_s27, 0  ;;  %s177_s26 = sand.u32 1, %s693_s14  }
  0x32   : > { %s447_s4 = sshll.u32 %s177_s26, 3  ;;  %s448_s6 = sshll.u32 %s701_s16, 7 }
  0x33   : > { %s839_s5 = scalar_select %p37_p11, %s693_s14, %s39_s25  }
  0x34   : > { %s845_s9 = scalar_lea.hbm %s951_s0, %s448_s6  ;;  %s181_s21 = scalar_lea.vmem [#allocation2], %s447_s4 }
  0x35   : > { %s188_s10 = sshll.u32 %s181_s21, 4  ;;  %p851_p13 = pnand %p501_p12, %p824_p6  ;;  %s847_s10 = int_to_ptr.vmem [resolvable:$true] %s188_s10 }
  0x36   : > { %s178_s18 = scalar_lea.sflag [#allocation3], %s177_s26  ;;  %s589_s19 = scalar_lea.hbm %s845_s9, 128 }
  0x37   : > { %p590_p0 = scmp.ne.s32.totalorder %s845_s9, %s589_s19  ;;  %p591_p3 = pneg %p851_p13 }
  0x38   : > { %s594_s4 = scalar_lea.hbm %s951_s0, 256  ;;  %p595_p9 = scmp.lt.u32.totalorder %s845_s9, %s951_s0 }
  0x39   : > { %p592_p5 = pnand %p591_p3, %p590_p0  ;;  %p596_p1 = scmp.lt.u32.totalorder %s594_s4, %s589_s19 }
  0x3a   : > { %p598_p4 = scmp.lt.u32.totalorder %s589_s19, %s845_s9 }
  0x3b   : > { %p593_p7 = pneg %p592_p5  ;;  %p597_p2 = por %p596_p1, %p595_p9 }
  0x3d   : > { %p599_p6 = por %p598_p4, %p597_p2 }
  0x3f   : > { %p600_p8 = pnand %p599_p6, %p593_p7 }
  0x41   : > { %603 = shalt.err (!%p600_p8)
}
  0x42   : > { %s604_s26 = scalar_lea.vmem %s847_s10, 128  ;;  %s710_s7 = smov [#allocation2]  }
  0x43   : > { %p605_p12 = scmp.ne.s32.totalorder %s847_s10, %s604_s26  ;;  %s609_s8 = sshll.u32 %s710_s7, 4  ;;  %s610_s8 = int_to_ptr.vmem [resolvable:$false] %s609_s8 }
  0x44   : > { %s611_s21 = scalar_lea.vmem %s610_s8, 256  ;;  %p612_p5 = scmp.lt.s32.totalorder %s847_s10, %s610_s8 }
  0x45   : > { %p607_p11 = pnand %p605_p12, %p591_p3  ;;  %p613_p9 = scmp.lt.s32.totalorder %s611_s21, %s604_s26 }
  0x47   : > { %p608_p0 = pneg %p607_p11  ;;  %p614_p1 = por %p613_p9, %p612_p5 }
  0x49   : > { %p615_p2 = pnand %p614_p1, %p608_p0 }
  0x4b   : > { %618 = shalt.err (!%p615_p2)
}
  0x4c   : > { %495 = dma.hbm_to_vmem [thread:$0]  (!%p851_p13), %s845_s9, 128, %s847_s10, %s178_s18  }
  0x4d   : > { %p969_p7 = scmp.ne.s32.totalorder %s963_s24, 0 }
  0x4e   : > { %s883_s19 = sand.u32 (!%p969_p7), 1, %s689_s13   ;;  %p970_p3 = scmp.ne.s32.totalorder (!%p969_p7), %s961_s22, 0 }
  0x4f   : > { %197 = sbr.rel (%p969_p7) target bundleno = 335 (0x14f), region = 32  ;;  %s450_s25 = sshll.u32 (!%p969_p7), %s883_s19, 3 }
  0x50   : > { %s200_s27 = scalar_lea.sflag (!%p969_p7), [#allocation3], %s883_s19  ;;  %s203_s4 = scalar_lea.vmem (!%p969_p7), [#allocation2], %s450_s25 }
  0x56   : > { %672 = dma.done.wait (%p970_p3), %s200_s27, 128  }
  0x57   : > { %674 = vsyncadd (%p970_p3), %s200_s27, 4294967168  ;;  %p971_p4 = scmp.ne.s32.totalorder %s959_s20, 0 }
  0x59   : > { %676 = dma.done.wait (%p971_p4), [#allocation6], 512  }
  0x5a   : > { %678 = vsyncadd (%p971_p4), [#allocation6], 4294966784  ;;  %v711_v0 = vmov 0.0   ;;  %vm712_vm0 = vmmov 0   ;;  %v557_v1 = vld [vmem:[#allocation5] sm:$0xff]   ;;  %v558_v2 = vld [vmem:[#allocation5 + $0x8] sm:$0xff]  }
  0x5b   : > { %468 = vmatprep.subr.bf16.mxu0 %v711_v0  ;;  %476 = vmatprep.mubr.msk.bf16.mxu0 %vm712_vm0, %v711_v0  ;;  %v559_v3 = vld [vmem:[#allocation5 + $0x10] sm:$0xff]   ;;  %v560_v4 = vld [vmem:[#allocation5 + $0x18] sm:$0xff]   ;;  %vm278_vm1 = vcmask 523264   ;;  %s460_s24 = sshll.u32 %s697_s15, 7  ;;  %s232_s9 = scalar_lea.vmem [#allocation7], %s450_s25 }
  0x5c   : > { %469 = vmatpush3.bf16.msra.mxu0 %v557_v1  ;;  %v237_v5 = vld [vmem:[%s203_s4] sm:$0xff]  ;;  %s338_s10 = sshll.u32 %s232_s9, 4  ;;  %s902_s29 = scalar_lea.hbm %s954_s3, %s460_s24  ;;  %s904_s10 = int_to_ptr.vmem [resolvable:$true] %s338_s10 }
  0x5d   : > { %470 = vmatprep.subr.bf16.mxu0 %v711_v0  ;;  %v238_v6 = vpack.c.bf16 %v237_v5, %v237_v5  ;;  %v453_v7 = vld [vmem:[%s953_s2] ss:$0 sm:$0xff]  ;;  %s324_s6 = scalar_lea.sflag [#allocation4], %s883_s19  ;;  %s619_s15 = scalar_lea.vmem %s904_s10, 128 }
  0x5e   : > { %p620_p13 = scmp.ne.s32.totalorder %s904_s10, %s619_s15  ;;  %s713_s26 = smov [#allocation7]  }
  0x5f   : > { %s623_s7 = sshll.u32 %s713_s26, 4  ;;  %s624_s7 = int_to_ptr.vmem [resolvable:$false] %s623_s7 }
  0x60   : > { %471 = vmatpush3.bf16.msra.mxu0 %v558_v2  ;;  %p621_p6 = pnand %p620_p13, %p830_p10  ;;  %s625_s8 = scalar_lea.vmem %s624_s7, 256 }
  0x61   : > { %472 = vmatprep.subr.bf16.mxu0 %v711_v0  ;;  %p626_p12 = scmp.lt.s32.totalorder %s904_s10, %s624_s7  ;;  %p627_p11 = scmp.lt.s32.totalorder %s625_s8, %s619_s15 }
  0x62   : > { %p622_p8 = pneg %p621_p6 }
  0x63   : > { %p628_p0 = por %p627_p11, %p626_p12 }
  0x64   : > { %473 = vmatpush3.bf16.msra.mxu0 %v559_v3 }
  0x65   : > { %474 = vmatprep.subr.bf16.mxu0 %v711_v0  ;;  %p629_p5 = pnand %p628_p0, %p622_p8 }
  0x68   : > { %475 = vmatpush3.bf16.msra.mxu0 %v560_v4 }
  0x6b   : > { %477 = vmatmul.mubr.msk.bf16.vlgmr.msra.gmra.mrb[0].mxu0 %vm278_vm1, %v238_v6 }
 0x13e   : > { %v316_v8 = vpop.f32.mrb[0].mxu0 }
 0x13f   : > { %v317_v9 = vadd.f32 %v453_v7, %v316_v8  ;;  %v478_v10 = vpop.f32.mrb[1].mxu0 }
 0x140   : > { %v319_v11 = vpop.f32.mrb[2].mxu0 }
 0x141   : > { %322 = vst [vmem:[%s232_s9] sm:$0xff] %v317_v9  ;;  %v479_v12 = vpop.f32.mrb[3].mxu0 }
 0x142   : > { %632 = shalt.err (!%p629_p5)
}
 0x143   : > { %s633_s21 = scalar_lea.hbm %s902_s29, 128  ;;  %s637_s27 = scalar_lea.hbm %s954_s3, 256 }
 0x144   : > { %p634_p9 = scmp.ne.s32.totalorder %s902_s29, %s633_s21  ;;  %p638_p7 = scmp.lt.u32.totalorder %s902_s29, %s954_s3 }
 0x145   : > { %p639_p3 = scmp.lt.u32.totalorder %s637_s27, %s633_s21  ;;  %p641_p13 = scmp.lt.u32.totalorder %s633_s21, %s902_s29 }
 0x146   : > { %p635_p1 = pnand %p634_p9, %p830_p10 }
 0x147   : > { %p640_p4 = por %p639_p3, %p638_p7 }
 0x148   : > { %p636_p2 = pneg %p635_p1 }
 0x149   : > { %p642_p6 = por %p641_p13, %p640_p4 }
 0x14b   : > { %p643_p8 = pnand %p642_p6, %p636_p2 }
 0x14d   : > { %646 = shalt.err (!%p643_p8)
}
 0x14e   : > { %486 = dma.vmem_to_hbm [thread:$0]  (%p830_p10), %s904_s10, 128, %s902_s29, %s324_s6  }
 0x14f PF: > { %s350_s22 = sand.u32 1, %s685_s12   ;;  %p972_p12 = scmp.ne.s32.totalorder %s962_s23, 0 }
 0x150   : > { %p973_p11 = scmp.ge.s32.totalorder %s705_s17, 2  ;;  %s351_s24 = scalar_lea.sflag [#allocation4], %s350_s22 }
 0x152   : > { %p497_p0 = pnand %p973_p11, %p972_p12 }
 0x154   : > { %680 = dma.done.wait (!%p497_p0), %s351_s24, 128  }
 0x155   : > { %682 = vsyncadd (!%p497_p0), %s351_s24, 4294967168  ;;  %s20_s17 = sadd.s32 1, %s705_s17   ;;  %s974_s12 = smov %s689_s13 }
 0x156   : > { %p17_p5 = scmp.ge.s32.totalorder %s20_s17, 4   ;;  %s975_s13 = smov %s693_s14 }
 0x157   : > { %s976_s14 = smov %s839_s5  ;;  %s977_s15 = smov %s701_s16 }
 0x158   : > { %s978_s16 = smov %s980_s28  ;;  %19 = sbr.rel (!%p17_p5) target bundleno = 7 (0x7), region = 85 }
 0x15f   :  { %356 = vsyncpa [#allocation3], 1 }
 0x160   :  { %358 = vsyncpa [#allocation3 + $0x1], 1 }
 0x161   :  { %359 = vsyncpa [#allocation6], 1 }
 0x162   :  { %360 = vsyncpa [#allocation4], 1 }
 0x163   :  { %362 = vsyncpa [#allocation4 + $0x1], 1 }

// kernel: tpu_custom_call.1
= control target key start
LH: loop header
LB: loop body
LE: loop exit
PB: predicated region body
PF: predicated region fallthrough
CT: control target
= control target key end

     0   :  { %8 = vsyncpa [#allocation3], 0  ;;  %s951_s0 = inlined_call_operand.hbm [shape: f32[16,64], index: 0, kind: input, shape index: {}]   ;;  %s952_s1 = inlined_call_operand.hbm [shape: bf16[64,128], index: 1, kind: input, shape index: {}]   ;;  %s953_s2 = inlined_call_operand.vmem [shape: f32[1,128], index: 2, kind: input, shape index: {}]   ;;  %s954_s3 = inlined_call_operand.hbm [shape: f32[16,128], index: 3, kind: output, shape index: {}]  }
   0x1   :  { %10 = vsyncpa [#allocation3 + $0x1], 0 }
   0x2   :  { %11 = vsyncpa [#allocation6], 0 }
   0x3   :  { %12 = vsyncpa [#allocation4], 0 }
   0x4   :  { %14 = vsyncpa [#allocation4 + $0x1], 0  ;;  %s734_s12 = smov 0   ;;  %s736_s13 = smov 0  }
   0x5   :  { %s738_s14 = smov 0   ;;  %s740_s15 = smov 0  }
   0x6   :  { %s742_s16 = smov 0   ;;  %s744_s17 = smov 0  }
   0x7 LB: > { %s441_s18 = sadd.s32 4294967295, %s705_s17   ;;  %s442_s19 = sadd.s32 4294967294, %s705_s17   ;;  %s705_s17 = sphi %s744_s17, %s20_s17   ;;  %s701_s16 = sphi %s742_s16, %s978_s16   ;;  %s697_s15 = sphi %s740_s15, %s977_s15   ;;  %s693_s14 = sphi %s738_s14, %s976_s14   ;;  %s689_s13 = sphi %s736_s13, %s975_s13   ;;  %s685_s12 = sphi %s734_s12, %s974_s12  }
   0x8   : > { %p52_p0 = scmp.ne.s32.totalorder %s689_s13, %s685_s12  ;;  %p768_p1 = scmp.eq.s32.totalorder %s441_s18, 0 }
   0x9   : > { %p772_p2 = scmp.eq.s32.totalorder %s441_s18, 1  ;;  %p136_p3 = scmp.eq.s32.totalorder %s442_s19, 1 }
   0xa   : > { %s959_s20 = scalar_select %p768_p1, 1, 0 }
   0xb   : > { %s960_s21 = scalar_select %p772_p2, 1, 0 }
   0xc   : > { %p778_p4 = por %p768_p1, %p52_p0  ;;  %p443_p5 = scmp.ge.s32.totalorder %s705_s17, 1 }
   0xd   : > { %p783_p6 = por %p136_p3, %p52_p0  ;;  %p143_p7 = scmp.lt.s32.totalorder %s705_s17, 3 }
   0xe   : > { %s961_s22 = scalar_select %p778_p4, 1, 0 }
   0xf   : > { %s962_s23 = scalar_select %p783_p6, 1, 0 }
  0x10   : > { %p788_p8 = pnand %p443_p5, %p143_p7  ;;  %s707_s25 = smov [#allocation5]  }
  0x11   : > { %s157_s26 = sshll.u32 %s707_s25, 4  ;;  %s29_s28 = sadd.s32 1, %s701_s16  ;;  %s158_s26 = int_to_ptr.vmem [resolvable:$true] %s157_s26 }
  0x12   : > { %s963_s24 = scalar_select %p788_p8, 1, 0 }
  0x13   : > { %p488_p9 = pneg %p788_p8  ;;  %s561_s4 = scalar_lea.hbm %s952_s1, 512 }
  0x14   : > { %p562_p12 = scmp.ne.s32.totalorder %s952_s1, %s561_s4  ;;  %p568_p5 = scmp.lt.u32.totalorder %s561_s4, %s952_s1 }
  0x15   : > { %p797_p11 = pnand %p488_p9, %p768_p1 }
  0x17   : > { %p563_p13 = pneg %p797_p11 }
  0x19   : > { %p564_p0 = pnand %p563_p13, %p562_p12 }
  0x1b   : > { %p565_p3 = pneg %p564_p0 }
  0x1d   : > { %p570_p7 = pnand %p568_p5, %p565_p3 }
  0x1f   : > { %573 = shalt.err (!%p570_p7)
}
  0x20   : > { %s574_s9 = scalar_lea.vmem %s158_s26, 512  ;;  %p582_p1 = scmp.lt.s32.totalorder %s158_s26, %s158_s26 }
  0x21   : > { %p575_p9 = scmp.ne.s32.totalorder %s158_s26, %s574_s9  ;;  %p583_p4 = scmp.lt.s32.totalorder %s574_s9, %s574_s9 }
  0x23   : > { %p577_p10 = pnand %p575_p9, %p563_p13  ;;  %p584_p8 = por %p583_p4, %p582_p1 }
  0x25   : > { %p578_p6 = pneg %p577_p10 }
  0x27   : > { %p585_p2 = pnand %p584_p8, %p578_p6 }
  0x29   : > { %588 = shalt.err (!%p585_p2)
}
  0x2a   : > { %s708_s10 = smov 64   ;;  %s709_s11 = smov 4  }
  0x2b   : > { %491 = dma.hbm_to_vmem [thread:$0]  (!%p797_p11), %s952_s1, 512, %s158_s26, [#allocation6], %s708_s10, %s708_s10, %s709_s11  }
  0x2c   : > { %p30_p1 = scmp.ge.s32.totalorder %s29_s28, 2  ;;  %s39_s25 = sadd.s32 1, %s693_s14 }
  0x2d   : > { %p46_p2 = scmp.ne.s32.totalorder %s693_s14, %s689_s13  ;;  %p47_p4 = scmp.eq.s32.totalorder %s705_s17, 0 }
  0x2e   : > { %s980_s28 = smov (%p30_p1, %s29_s28), 0  ;;  %p966_p8 = scmp.ne.s32.totalorder %s960_s21, 0 }
  0x2f   : > { %p824_p6 = por %p47_p4, %p46_p2  ;;  %s36_s27 = ssub.s32 %s701_s16, %s980_s28 }
  0x30   : > { %p830_p10 = por %p966_p8, %p46_p2  ;;  %p501_p12 = scmp.lt.s32.totalorder %s705_s17, 2 }
  0x31   : > { %p37_p11 = scmp.eq.s32.totalorder %s36_s27, 0  ;;  %s177_s26 = sand.u32 1, %s693_s14  }
  0x32   : > { %s447_s4 = sshll.u32 %s177_s26, 3  ;;  %s448_s6 = sshll.u32 %s701_s16, 7 }
  0x33   : > { %s839_s5 = scalar_select %p37_p11, %s693_s14, %s39_s25  }
  0x34   : > { %s845_s9 = scalar_lea.hbm %s951_s0, %s448_s6  ;;  %s181_s21 = scalar_lea.vmem [#allocation2], %s447_s4 }
  0x35   : > { %s188_s10 = sshll.u32 %s181_s21, 4  ;;  %p851_p13 = pnand %p501_p12, %p824_p6  ;;  %s847_s10 = int_to_ptr.vmem [resolvable:$true] %s188_s10 }
  0x36   : > { %s178_s18 = scalar_lea.sflag [#allocation3], %s177_s26  ;;  %s589_s19 = scalar_lea.hbm %s845_s9, 128 }
  0x37   : > { %p590_p0 = scmp.ne.s32.totalorder %s845_s9, %s589_s19  ;;  %p591_p3 = pneg %p851_p13 }
  0x38   : > { %s594_s4 = scalar_lea.hbm %s951_s0, 256  ;;  %p595_p9 = scmp.lt.u32.totalorder %s845_s9, %s951_s0 }
  0x39   : > { %p592_p5 = pnand %p591_p3, %p590_p0  ;;  %p596_p1 = scmp.lt.u32.totalorder %s594_s4, %s589_s19 }
  0x3a   : > { %p598_p4 = scmp.lt.u32.totalorder %s589_s19, %s845_s9 }
  0x3b   : > { %p593_p7 = pneg %p592_p5  ;;  %p597_p2 = por %p596_p1, %p595_p9 }
  0x3d   : > { %p599_p6 = por %p598_p4, %p597_p2 }
  0x3f   : > { %p600_p8 = pnand %p599_p6, %p593_p7 }
  0x41   : > { %603 = shalt.err (!%p600_p8)
}
  0x42   : > { %s604_s26 = scalar_lea.vmem %s847_s10, 128  ;;  %s710_s7 = smov [#allocation2]  }
  0x43   : > { %p605_p12 = scmp.ne.s32.totalorder %s847_s10, %s604_s26  ;;  %s609_s8 = sshll.u32 %s710_s7, 4  ;;  %s610_s8 = int_to_ptr.vmem [resolvable:$false] %s609_s8 }
  0x44   : > { %s611_s21 = scalar_lea.vmem %s610_s8, 256  ;;  %p612_p5 = scmp.lt.s32.totalorder %s847_s10, %s610_s8 }
  0x45   : > { %p607_p11 = pnand %p605_p12, %p591_p3  ;;  %p613_p9 = scmp.lt.s32.totalorder %s611_s21, %s604_s26 }
  0x47   : > { %p608_p0 = pneg %p607_p11  ;;  %p614_p1 = por %p613_p9, %p612_p5 }
  0x49   : > { %p615_p2 = pnand %p614_p1, %p608_p0 }
  0x4b   : > { %618 = shalt.err (!%p615_p2)
}
  0x4c   : > { %495 = dma.hbm_to_vmem [thread:$0]  (!%p851_p13), %s845_s9, 128, %s847_s10, %s178_s18  }
  0x4d   : > { %p969_p7 = scmp.ne.s32.totalorder %s963_s24, 0 }
  0x4e   : > { %s883_s19 = sand.u32 (!%p969_p7), 1, %s689_s13   ;;  %p970_p3 = scmp.ne.s32.totalorder (!%p969_p7), %s961_s22, 0 }
  0x4f   : > { %197 = sbr.rel (%p969_p7) target bundleno = 335 (0x14f), region = 32  ;;  %s450_s25 = sshll.u32 (!%p969_p7), %s883_s19, 3 }
  0x50   : > { %s200_s27 = scalar_lea.sflag (!%p969_p7), [#allocation3], %s883_s19  ;;  %s203_s4 = scalar_lea.vmem (!%p969_p7), [#allocation2], %s450_s25 }
  0x56   : > { %672 = dma.done.wait (%p970_p3), %s200_s27, 128  }
  0x57   : > { %674 = vsyncadd (%p970_p3), %s200_s27, 4294967168  ;;  %p971_p4 = scmp.ne.s32.totalorder %s959_s20, 0 }
  0x59   : > { %676 = dma.done.wait (%p971_p4), [#allocation6], 512  }
  0x5a   : > { %678 = vsyncadd (%p971_p4), [#allocation6], 4294966784  ;;  %v711_v0 = vmov 0.0   ;;  %vm712_vm0 = vmmov 0   ;;  %v557_v1 = vld [vmem:[#allocation5] sm:$0xff]   ;;  %v558_v2 = vld [vmem:[#allocation5 + $0x8] sm:$0xff]  }
  0x5b   : > { %468 = vmatprep.subr.bf16.mxu0 %v711_v0  ;;  %476 = vmatprep.mubr.msk.bf16.mxu0 %vm712_vm0, %v711_v0  ;;  %v559_v3 = vld [vmem:[#allocation5 + $0x10] sm:$0xff]   ;;  %v560_v4 = vld [vmem:[#allocation5 + $0x18] sm:$0xff]   ;;  %vm278_vm1 = vcmask 523264   ;;  %s460_s24 = sshll.u32 %s697_s15, 7  ;;  %s232_s9 = scalar_lea.vmem [#allocation7], %s450_s25 }
  0x5c   : > { %469 = vmatpush3.bf16.msra.mxu0 %v557_v1  ;;  %v237_v5 = vld [vmem:[%s203_s4] sm:$0xff]  ;;  %s338_s10 = sshll.u32 %s232_s9, 4  ;;  %s902_s29 = scalar_lea.hbm %s954_s3, %s460_s24  ;;  %s904_s10 = int_to_ptr.vmem [resolvable:$true] %s338_s10 }
  0x5d   : > { %470 = vmatprep.subr.bf16.mxu0 %v711_v0  ;;  %v238_v6 = vpack.c.bf16 %v237_v5, %v237_v5  ;;  %v453_v7 = vld [vmem:[%s953_s2] ss:$0 sm:$0xff]  ;;  %s324_s6 = scalar_lea.sflag [#allocation4], %s883_s19  ;;  %s619_s15 = scalar_lea.vmem %s904_s10, 128 }
  0x5e   : > { %p620_p13 = scmp.ne.s32.totalorder %s904_s10, %s619_s15  ;;  %s713_s26 = smov [#allocation7]  }
  0x5f   : > { %s623_s7 = sshll.u32 %s713_s26, 4  ;;  %s624_s7 = int_to_ptr.vmem [resolvable:$false] %s623_s7 }
  0x60   : > { %471 = vmatpush3.bf16.msra.mxu0 %v558_v2  ;;  %p621_p6 = pnand %p620_p13, %p830_p10  ;;  %s625_s8 = scalar_lea.vmem %s624_s7, 256 }
  0x61   : > { %472 = vmatprep.subr.bf16.mxu0 %v711_v0  ;;  %p626_p12 = scmp.lt.s32.totalorder %s904_s10, %s624_s7  ;;  %p627_p11 = scmp.lt.s32.totalorder %s625_s8, %s619_s15 }
  0x62   : > { %p622_p8 = pneg %p621_p6 }
  0x63   : > { %p628_p0 = por %p627_p11, %p626_p12 }
  0x64   : > { %473 = vmatpush3.bf16.msra.mxu0 %v559_v3 }
  0x65   : > { %474 = vmatprep.subr.bf16.mxu0 %v711_v0  ;;  %p629_p5 = pnand %p628_p0, %p622_p8 }
  0x68   : > { %475 = vmatpush3.bf16.msra.mxu0 %v560_v4 }
  0x6b   : > { %477 = vmatmul.mubr.msk.bf16.vlgmr.msra.gmra.mrb[0].mxu0 %vm278_vm1, %v238_v6 }
 0x13e   : > { %v316_v8 = vpop.f32.mrb[0].mxu0 }
 0x13f   : > { %v317_v9 = vadd.f32 %v453_v7, %v316_v8  ;;  %v478_v10 = vpop.f32.mrb[1].mxu0 }
 0x140   : > { %v319_v11 = vpop.f32.mrb[2].mxu0 }
 0x141   : > { %322 = vst [vmem:[%s232_s9] sm:$0xff] %v317_v9  ;;  %v479_v12 = vpop.f32.mrb[3].mxu0 }
 0x142   : > { %632 = shalt.err (!%p629_p5)
}
 0x143   : > { %s633_s21 = scalar_lea.hbm %s902_s29, 128  ;;  %s637_s27 = scalar_lea.hbm %s954_s3, 256 }
 0x144   : > { %p634_p9 = scmp.ne.s32.totalorder %s902_s29, %s633_s21  ;;  %p638_p7 = scmp.lt.u32.totalorder %s902_s29, %s954_s3 }
 0x145   : > { %p639_p3 = scmp.lt.u32.totalorder %s637_s27, %s633_s21  ;;  %p641_p13 = scmp.lt.u32.totalorder %s633_s21, %s902_s29 }
 0x146   : > { %p635_p1 = pnand %p634_p9, %p830_p10 }
 0x147   : > { %p640_p4 = por %p639_p3, %p638_p7 }
 0x148   : > { %p636_p2 = pneg %p635_p1 }
 0x149   : > { %p642_p6 = por %p641_p13, %p640_p4 }
 0x14b   : > { %p643_p8 = pnand %p642_p6, %p636_p2 }
 0x14d   : > { %646 = shalt.err (!%p643_p8)
}
 0x14e   : > { %486 = dma.vmem_to_hbm [thread:$0]  (%p830_p10), %s904_s10, 128, %s902_s29, %s324_s6  }
 0x14f PF: > { %s350_s22 = sand.u32 1, %s685_s12   ;;  %p972_p12 = scmp.ne.s32.totalorder %s962_s23, 0 }
 0x150   : > { %p973_p11 = scmp.ge.s32.totalorder %s705_s17, 2  ;;  %s351_s24 = scalar_lea.sflag [#allocation4], %s350_s22 }
 0x152   : > { %p497_p0 = pnand %p973_p11, %p972_p12 }
 0x154   : > { %680 = dma.done.wait (!%p497_p0), %s351_s24, 128  }
 0x155   : > { %682 = vsyncadd (!%p497_p0), %s351_s24, 4294967168  ;;  %s20_s17 = sadd.s32 1, %s705_s17   ;;  %s974_s12 = smov %s689_s13 }
 0x156   : > { %p17_p5 = scmp.ge.s32.totalorder %s20_s17, 4   ;;  %s975_s13 = smov %s693_s14 }
 0x157   : > { %s976_s14 = smov %s839_s5  ;;  %s977_s15 = smov %s701_s16 }
 0x158   : > { %s978_s16 = smov %s980_s28  ;;  %19 = sbr.rel (!%p17_p5) target bundleno = 7 (0x7), region = 85 }
 0x15f   :  { %356 = vsyncpa [#allocation3], 1 }
 0x160   :  { %358 = vsyncpa [#allocation3 + $0x1], 1 }
 0x161   :  { %359 = vsyncpa [#allocation6], 1 }
 0x162   :  { %360 = vsyncpa [#allocation4], 1 }
 0x163   :  { %362 = vsyncpa [#allocation4 + $0x1], 1 }

</bundles_post_ra>
